<compile_context>
chip_gen: v7x
topology: tpu7x:2x2x1
jax: 0.10.0
libtpu: 0.0.40
codegen_flags: <defaults>
</compile_context>

<pallas_src>
import jax
import jax.numpy as jnp
from jax.experimental import pallas as pl
from jax.experimental.pallas import tpu as pltpu

IN_F = 3
HID = 64
OUT_F = 28 * 28          # 784  (PyTorch module output width)


def _round_up(x, m):
    return ((x + m - 1) // m) * m


def _choose_tm(rows, cap):
    """Largest multiple of 8 that divides `rows`, is <= cap, and (when possible)
    leaves the grid with >= 2 steps so writeback pipelines / cores share work."""
    target = min(cap, rows)
    if rows >= 16:
        target = min(target, _round_up((rows + 1) // 2, 8))
    best = 8
    for d in range(8, target + 1, 8):
        if rows % d == 0:
            best = d
    return best


def decoder_kernel(x_ref, w1_ref, b1_ref, w2_ref, b2_ref, o_ref):
    # x_ref:  (TM, 3)    f32
    # w1_ref: (3, 64)    f32
    # b1_ref: (1, 64)    f32
    # w2_ref: (64, 784)  f32
    # b2_ref: (1, 784)   f32
    # o_ref:  (TM, 784)  f32
    x = x_ref[...]
    w1 = w1_ref[...]

    # Layer 1 on the VPU: K=3 is too small for the MXU; three broadcasted FMAs instead.
    h = (x[:, 0:1] * w1[0:1, :]
         + x[:, 1:2] * w1[1:2, :]
         + x[:, 2:3] * w1[2:3, :]) + b1_ref[...]
    h = jnp.maximum(h, 0.0)                       # ReLU

    # Layer 2 on the MXU: f32 operands, f32 accumulation.
    out = jnp.dot(h, w2_ref[...], preferred_element_type=jnp.float32)
    o_ref[...] = (out + b2_ref[...]).astype(o_ref.dtype)


def decoder_forward(x, w1, b1, w2, b2, *, tm=1024):
    """out = relu(x @ w1 + b1) @ w2 + b2, x: (B, 3) f32, returns (B, 784) f32."""
    B = x.shape[0]
    B_pad = _round_up(B, 8)                       # sublane alignment only
    TM = _choose_tm(B_pad, tm)

    if B_pad != B:                                # only for batches not a multiple of 8
        x = jnp.pad(x, ((0, B_pad - B), (0, 0)))

    grid = (B_pad // TM,)

    cost = pl.CostEstimate(
        flops=2 * B_pad * (IN_F * HID + HID * OUT_F),
        transcendentals=0,
        bytes_accessed=(x.size * 4 + w1.size * 4 + b1.size * 4
                        + w2.size * 4 + b2.size * 4 + B_pad * OUT_F * 4),
    )

    out = pl.pallas_call(
        decoder_kernel,
        out_shape=jax.ShapeDtypeStruct((B_pad, OUT_F), jnp.float32),
        grid=grid,
        in_specs=[
            pl.BlockSpec((TM, IN_F), lambda i: (i, 0)),     # x: tiled over batch
            pl.BlockSpec((IN_F, HID), lambda i: (0, 0)),    # w1: resident
            pl.BlockSpec((1, HID), lambda i: (0, 0)),       # b1: resident
            pl.BlockSpec((HID, OUT_F), lambda i: (0, 0)),   # w2: resident
            pl.BlockSpec((1, OUT_F), lambda i: (0, 0)),     # b2: resident
        ],
        out_specs=pl.BlockSpec((TM, OUT_F), lambda i: (i, 0)),
        compiler_params=pltpu.CompilerParams(
            dimension_semantics=("parallel",),
        ),
        cost_estimate=cost,
    )(x, w1, b1, w2, b2)

    if B_pad != B:
        out = out[:B]
    return out


def init_params(key):
    # Mimics PyTorch nn.Linear default init: U(-1/sqrt(fan_in), 1/sqrt(fan_in)).
    k1, k2, k3, k4 = jax.random.split(key, 4)
    bound1 = 1.0 / jnp.sqrt(IN_F)
    bound2 = 1.0 / jnp.sqrt(HID)
    w1 = jax.random.uniform(k1, (IN_F, HID), jnp.float32, -bound1, bound1)
    b1 = jax.random.uniform(k2, (1, HID), jnp.float32, -bound1, bound1)
    w2 = jax.random.uniform(k3, (HID, OUT_F), jnp.float32, -bound2, bound2)
    b2 = jax.random.uniform(k4, (1, OUT_F), jnp.float32, -bound2, bound2)
    return w1, b1, w2, b2


def reference_forward(x, w1, b1, w2, b2):
    h = jnp.maximum(x @ w1 + b1, 0.0)
    return h @ w2 + b2


if __name__ == "__main__":
    key = jax.random.PRNGKey(0)
    pkey, xkey = jax.random.split(key)
    w1, b1, w2, b2 = init_params(pkey)

    # Small batch of 3-dim latent codes; B=64 -> TM=32, grid=(2,) exercises a
    # multi-step batch grid with no batch padding and no post-call slicing.
    B = 64
    x = jax.random.normal(xkey, (B, IN_F), dtype=jnp.float32)

    out = decoder_forward(x, w1, b1, w2, b2)
    out = jax.block_until_ready(out)

    ref = reference_forward(x, w1, b1, w2, b2)
    assert out.shape == (B, OUT_F), out.shape
    # All-f32 path -> tight tolerance vs the f32 reference.
    assert jnp.allclose(out, ref, atol=1e-4, rtol=1e-4), "mismatch vs reference"

    # Also check an odd batch size (exercises the batch pad/slice fallback path).
    out_small = jax.block_until_ready(decoder_forward(x[:5], w1, b1, w2, b2))
    assert out_small.shape == (5, OUT_F)
    assert jnp.allclose(out_small, ref[:5], atol=1e-4, rtol=1e-4), "mismatch (padded batch)"

    print("KERNEL_OK")
</pallas_src>

<mosaic_0001>
module attributes {stable_mosaic.version = 11 : i64} {
  func.func @decoder_kernel(%arg0: i32, %arg1: memref<32x3xf32, #tpu.memory_space<vmem>>, %arg2: memref<3x64xf32, #tpu.memory_space<vmem>>, %arg3: memref<1x64xf32, #tpu.memory_space<vmem>>, %arg4: memref<64x784xf32, #tpu.memory_space<vmem>>, %arg5: memref<1x784xf32, #tpu.memory_space<vmem>>, %arg6: memref<32x784xf32, #tpu.memory_space<vmem>>) attributes {dimension_semantics = [#tpu.dimension_semantics<parallel>], iteration_bounds = array<i64: 2>, scalar_prefetch = 0 : i64, scratch_operands = 0 : i64, tpu.core_type = #tpu.core_type<tc>, window_params = [{transform_indices = @transform_0, window_bounds = array<i64: 32, 3>}, {pipeline_mode = #tpu.pipeline_mode<synchronous>, transform_indices = @transform_1, window_bounds = array<i64: 3, 64>}, {pipeline_mode = #tpu.pipeline_mode<synchronous>, transform_indices = @transform_2, window_bounds = array<i64: 1, 64>}, {pipeline_mode = #tpu.pipeline_mode<synchronous>, transform_indices = @transform_3, window_bounds = array<i64: 64, 784>}, {pipeline_mode = #tpu.pipeline_mode<synchronous>, transform_indices = @transform_4, window_bounds = array<i64: 1, 784>}, {transform_indices = @transform_5, window_bounds = array<i64: 32, 784>}]} {
    %c0 = arith.constant 0 : index
    %c0_0 = arith.constant 0 : index
    %0 = vector.load %arg1[%c0, %c0_0] : memref<32x3xf32, #tpu.memory_space<vmem>>, vector<32x3xf32>
    %c0_1 = arith.constant 0 : index
    %c0_2 = arith.constant 0 : index
    %1 = vector.load %arg2[%c0_1, %c0_2] : memref<3x64xf32, #tpu.memory_space<vmem>>, vector<3x64xf32>
    %2 = vector.extract_strided_slice %0 {offsets = [0, 0], sizes = [32, 1], strides = [1, 1]} : vector<32x3xf32> to vector<32x1xf32>
    %3 = vector.extract_strided_slice %1 {offsets = [0, 0], sizes = [1, 64], strides = [1, 1]} : vector<3x64xf32> to vector<1x64xf32>
    %4 = vector.broadcast %2 : vector<32x1xf32> to vector<32x64xf32>
    %5 = vector.broadcast %3 : vector<1x64xf32> to vector<32x64xf32>
    %6 = arith.mulf %4, %5 : vector<32x64xf32>
    %7 = vector.extract_strided_slice %0 {offsets = [0, 1], sizes = [32, 1], strides = [1, 1]} : vector<32x3xf32> to vector<32x1xf32>
    %8 = vector.extract_strided_slice %1 {offsets = [1, 0], sizes = [1, 64], strides = [1, 1]} : vector<3x64xf32> to vector<1x64xf32>
    %9 = vector.broadcast %7 : vector<32x1xf32> to vector<32x64xf32>
    %10 = vector.broadcast %8 : vector<1x64xf32> to vector<32x64xf32>
    %11 = arith.mulf %9, %10 : vector<32x64xf32>
    %12 = arith.addf %6, %11 : vector<32x64xf32>
    %13 = vector.extract_strided_slice %0 {offsets = [0, 2], sizes = [32, 1], strides = [1, 1]} : vector<32x3xf32> to vector<32x1xf32>
    %14 = vector.extract_strided_slice %1 {offsets = [2, 0], sizes = [1, 64], strides = [1, 1]} : vector<3x64xf32> to vector<1x64xf32>
    %15 = vector.broadcast %13 : vector<32x1xf32> to vector<32x64xf32>
    %16 = vector.broadcast %14 : vector<1x64xf32> to vector<32x64xf32>
    %17 = arith.mulf %15, %16 : vector<32x64xf32>
    %18 = arith.addf %12, %17 : vector<32x64xf32>
    %c0_3 = arith.constant 0 : index
    %c0_4 = arith.constant 0 : index
    %19 = vector.load %arg3[%c0_3, %c0_4] : memref<1x64xf32, #tpu.memory_space<vmem>>, vector<1x64xf32>
    %20 = vector.broadcast %19 : vector<1x64xf32> to vector<32x64xf32>
    %21 = arith.addf %18, %20 : vector<32x64xf32>
    %cst = arith.constant 0.000000e+00 : f32
    %22 = vector.broadcast %cst : f32 to vector<32x64xf32>
    %23 = arith.maximumf %21, %22 : vector<32x64xf32>
    %c0_5 = arith.constant 0 : index
    %c0_6 = arith.constant 0 : index
    %24 = vector.load %arg4[%c0_5, %c0_6] : memref<64x784xf32, #tpu.memory_space<vmem>>, vector<64x784xf32>
    %cst_7 = arith.constant dense<0.000000e+00> : vector<32x784xf32>
    %25 = tpu.matmul %23, %24, %cst_7 {dimension_numbers = #tpu.dot_dimension_numbers<[1], [0], [0], [1], [0, 0, 1, 1], [], []>} : vector<32x64xf32>, vector<64x784xf32>, vector<32x784xf32> -> vector<32x784xf32>
    %c0_8 = arith.constant 0 : index
    %c0_9 = arith.constant 0 : index
    %26 = vector.load %arg5[%c0_8, %c0_9] : memref<1x784xf32, #tpu.memory_space<vmem>>, vector<1x784xf32>
    %27 = vector.broadcast %26 : vector<1x784xf32> to vector<32x784xf32>
    %28 = arith.addf %25, %27 : vector<32x784xf32>
    %c0_10 = arith.constant 0 : index
    %c0_11 = arith.constant 0 : index
    %29 = vector.load %arg6[%c0_10, %c0_11] : memref<32x784xf32, #tpu.memory_space<vmem>>, vector<32x784xf32>
    tpu.vector_store %arg6[%c0_10, %c0_11], %28 {strides = array<i32>} : memref<32x784xf32, #tpu.memory_space<vmem>>, vector<32x784xf32>,
    return
  }
  func.func @transform_0(%arg0: i32) -> (i32, i32) {
    %c0_i32 = arith.constant 0 : i32
    %c0_i32_0 = arith.constant 0 : i32
    return %arg0, %c0_i32 : i32, i32
  }
  func.func @transform_1(%arg0: i32) -> (i32, i32) {
    %c0_i32 = arith.constant 0 : i32
    %c0_i32_0 = arith.constant 0 : i32
    %c0_i32_1 = arith.constant 0 : i32
    return %c0_i32, %c0_i32_0 : i32, i32
  }
  func.func @transform_2(%arg0: i32) -> (i32, i32) {
    %c0_i32 = arith.constant 0 : i32
    %c0_i32_0 = arith.constant 0 : i32
    %c0_i32_1 = arith.constant 0 : i32
    return %c0_i32, %c0_i32_0 : i32, i32
  }
  func.func @transform_3(%arg0: i32) -> (i32, i32) {
    %c0_i32 = arith.constant 0 : i32
    %c0_i32_0 = arith.constant 0 : i32
    %c0_i32_1 = arith.constant 0 : i32
    return %c0_i32, %c0_i32_0 : i32, i32
  }
  func.func @transform_4(%arg0: i32) -> (i32, i32) {
    %c0_i32 = arith.constant 0 : i32
    %c0_i32_0 = arith.constant 0 : i32
    %c0_i32_1 = arith.constant 0 : i32
    return %c0_i32, %c0_i32_0 : i32, i32
  }
  func.func @transform_5(%arg0: i32) -> (i32, i32) {
    %c0_i32 = arith.constant 0 : i32
    %c0_i32_0 = arith.constant 0 : i32
    return %arg0, %c0_i32 : i32, i32
  }
}

</mosaic_0001>

<bundles_post_ra>
// kernel: tpu_custom_call.1
= control target key start
LH: loop header
LB: loop body
LE: loop exit
PB: predicated region body
PF: predicated region fallthrough
CT: control target
= control target key end

     0   :  { %10 = vsyncpa [#allocation3], 0  ;;  %s1545_s0 = inlined_call_operand.vmem [shape: f32[64,3], index: 0, kind: input, shape index: {}]   ;;  %s1546_s1 = inlined_call_operand.vmem [shape: f32[3,64], index: 1, kind: input, shape index: {}]   ;;  %s1547_s2 = inlined_call_operand.vmem [shape: f32[1,64], index: 2, kind: input, shape index: {}]   ;;  %s1548_s3 = inlined_call_operand.hbm [shape: f32[64,784], index: 3, kind: input, shape index: {}]   ;;  %s1549_s4 = inlined_call_operand.vmem [shape: f32[1,784], index: 4, kind: input, shape index: {}]   ;;  %s1550_s5 = inlined_call_operand.hbm [shape: f32[64,784], index: 5, kind: output, shape index: {}]  }
   0x1   :  { %11 = vsyncpa [#allocation4], 0 }
   0x2   :  { %13 = vsyncpa [#allocation4 + $0x1], 0  ;;  %s1257_s18 = smov 0   ;;  %s1259_s19 = smov 0  }
   0x3   :  { %s1261_s20 = smov 0   ;;  %s1263_s21 = smov 0  }
   0x4 LB: > { %s1278_s22 = sadd.s32 4294967295, %s1215_s21   ;;  %s921_s23 = sadd.s32 4294967294, %s1215_s21   ;;  %s1215_s21 = sphi %s1263_s21, %s1566_s21   ;;  %s1211_s20 = sphi %s1261_s20, %s1565_s20   ;;  %s1207_s19 = sphi %s1259_s19, %s1564_s19   ;;  %s1203_s18 = sphi %s1257_s18, %s1563_s18  }
   0x5   : > { %s1282_s24 = sadd.s32 1, %s1215_s21   ;;  %s136_s25 = sadd.s32 1, %s1211_s20 }
   0x6   : > { %s133_s26 = ssub.s32 %s1215_s21, %s1282_s24  ;;  %p146_p0 = scmp.ne.s32.totalorder %s1211_s20, %s1207_s19 }
   0x7   : > { %p134_p1 = scmp.eq.s32.totalorder %s133_s26, 0  ;;  %p147_p2 = scmp.eq.s32.totalorder %s1278_s22, 1 }
   0x8   : > { %p152_p3 = scmp.ne.s32.totalorder %s1207_s19, %s1203_s18  ;;  %p153_p4 = scmp.eq.s32.totalorder %s921_s23, 1 }
   0x9   : > { %s1293_s27 = scalar_select %p134_p1, %s1211_s20, %s136_s25  }
   0xa   : > { %p1295_p5 = por %p147_p2, %p146_p0  ;;  %p1299_p6 = por %p153_p4, %p152_p3 }
   0xb   : > { %p922_p7 = scmp.ge.s32.totalorder %s1215_s21, 1  ;;  %p160_p8 = scmp.lt.s32.totalorder %s1215_s21, 3 }
   0xc   : > { %s1554_s28 = scalar_select %p1295_p5, 1, 0 }
   0xd   : > { %s1555_s29 = scalar_select %p1299_p6, 1, 0 }
   0xe   : > { %p1551_p9 = scmp.eq.s32.totalorder %s1278_s22, 0  ;;  %p1306_p10 = pnand %p922_p7, %p160_p8 }
   0xf   : > { %s1217_s6 = smov [#allocation2]   ;;  %s1121_s11 = scalar_lea.hbm %s1548_s3, 7168 }
  0x10   : > { %s1556_s30 = scalar_select %p1306_p10, 1, 0 }
  0x11   : > { %s178_s7 = sshll.u32 %s1217_s6, 4  ;;  %p1057_p11 = pneg %p1306_p10  ;;  %s179_s7 = int_to_ptr.vmem [resolvable:$true] %s178_s7 }
  0x12   : > { %p1122_p13 = scmp.ne.s32.totalorder %s1548_s3, %s1121_s11  ;;  %p1128_p3 = scmp.lt.u32.totalorder %s1121_s11, %s1548_s3 }
  0x13   : > { %p1314_p12 = pnand %p1551_p9, %p1057_p11 }
  0x15   : > { %p1123_p0 = pneg %p1314_p12 }
  0x17   : > { %p1124_p1 = pnand %p1123_p0, %p1122_p13 }
  0x19   : > { %p1125_p2 = pneg %p1124_p1 }
  0x1b   : > { %p1130_p4 = pnand %p1128_p3, %p1125_p2 }
  0x1d   : > { %1133 = shalt.err (!%p1130_p4)
}
  0x1e   : > { %s1134_s16 = scalar_lea.vmem %s179_s7, 7168  ;;  %p1142_p9 = scmp.lt.s32.totalorder %s179_s7, %s179_s7 }
  0x1f   : > { %p1135_p7 = scmp.ne.s32.totalorder %s179_s7, %s1134_s16  ;;  %p1143_p6 = scmp.lt.s32.totalorder %s1134_s16, %s1134_s16 }
  0x21   : > { %p1137_p8 = pnand %p1135_p7, %p1123_p0  ;;  %p1144_p5 = por %p1143_p6, %p1142_p9 }
  0x23   : > { %p1138_p11 = pneg %p1137_p8 }
  0x25   : > { %p1145_p10 = pnand %p1144_p5, %p1138_p11 }
  0x27   : > { %1148 = shalt.err (!%p1145_p10)
}
  0x28   : > { %s1218_s17 = smov 896   ;;  %s1219_s23 = smov 56  }
  0x29   : > { %1060 = dma.hbm_to_vmem [thread:$0]  (!%p1314_p12), %s1548_s3, 7168, %s179_s7, [#allocation3], %s1218_s17, %s1218_s17, %s1219_s23  }
  0x2a   : > { %p1558_p13 = scmp.ne.s32.totalorder %s1556_s30, 0 }
  0x2b   : > { %p1559_p1 = scmp.eq.s32.totalorder (!%p1558_p13), %s1278_s22, 0 }
  0x2c   : > { %206 = sbr.rel (%p1558_p13) target bundleno = 471 (0x1d7), region = 40 }
  0x33   : > { %1194 = dma.done.wait (%p1559_p1), [#allocation3], 7168   ;;  %p1560_p0 = pmov %p1559_p1 }
  0x34   : > { %s927_s6 = sshll.u32 %s1278_s22, 2  ;;  %v1220_v0 = vmov 2   ;;  %v1221_v1 = vmov 0   ;;  %v346_v3 = vld [vmem:[#allocation2 + $0x8] sm:$0xff]  ;;  %v353_v4 = vld [vmem:[#allocation2 + $0x40] sm:$0xff]  ;;  %v348_v7 = vld [vmem:[#allocation2 + $0x18] sm:$0xff]  ;;  %v266_v62 = vlaneseq }
  0x35   : > { %1196 = vsyncadd (%p1560_p0), [#allocation3], 4294960128  ;;  %1111 = vset.pattern.permute.xlu1 %v1220_v0  ;;  %1109 = vset.pattern.permute.xlu0 %v1221_v1  ;;  %p235_p5 = scmp.lt.s32.totalorder %s927_s6, 7  ;;  %v985_v6 = vpack.c.bf16 %v353_v4, %v346_v3  ;;  %v355_v8 = vld [vmem:[#allocation2 + $0x50] sm:$0xff]  ;;  %v345_v10 = vld [vmem:[#allocation2] sm:$0xff]  ;;  %v1222_v17 = vmov 1  }
  0x36   : > { %v1001_v9 = vpack.c.bf16 %v355_v8, %v348_v7  ;;  %v352_v11 = vld [vmem:[#allocation2 + $0x38] sm:$0xff]  ;;  %v347_v12 = vld [vmem:[#allocation2 + $0x10] sm:$0xff]  ;;  %v354_v14 = vld [vmem:[#allocation2 + $0x48] sm:$0xff]  ;;  %v1223_v55 = vmov 0.0   ;;  %v1364_v63 = vshrl.u32 %v266_v62, 7  ;;  %vm438_vm0 = vcmask 523264  }
  0x37   : > { %s1568_s6 = smov (!%p235_p5, %s927_s6), 7  ;;  %986 = vmatprep.subr.bf16.mxu0 %v985_v6  ;;  %v987_v13 = vpack.c.bf16 %v352_v11, %v345_v10  ;;  %v360_v15 = vld [vmem:[#allocation2 + $0x78] sm:$0xff]  ;;  %v367_v16 = vld [vmem:[#allocation2 + $0xb0] sm:$0xff]  ;;  %v1003_v18 = vpack.c.bf16 %v354_v14, %v347_v12  ;;  %v362_v20 = vld [vmem:[#allocation2 + $0x88] sm:$0xff]  ;;  %515 = vmatprep.mubr.f32.mxu0 %v1223_v55  ;;  %s231_s14 = sand.u32 1, %s1207_s19   ;;  %vm809_vm1 = vcmask 130048  }
  0x38   : > { %s928_s7 = sshll.u32 %s1568_s6, 3  ;;  %v989_v19 = vpack.c.bf16 %v367_v16, %v360_v15  ;;  %v369_v21 = vld [vmem:[#allocation2 + $0xc0] sm:$0xff]  ;;  %v359_v22 = vld [vmem:[#allocation2 + $0x70] sm:$0xff]  ;;  %v366_v24 = vld [vmem:[#allocation2 + $0xa8] sm:$0xff]  ;;  %1002 = vmatprep.subr.bf16.mxu1 %v1001_v9  ;;  %604 = vmatprep.mubr.f32.mxu1 %v1223_v55  ;;  %v292_v3 = vsub.s32 1, %v1364_v63  ;;  %v320_v4 = vsub.s32 2, %v1364_v63 }
  0x39   : > { %s1346_s9 = scalar_lea.vmem %s1545_s0, %s928_s7  ;;  %v1005_v23 = vpack.c.bf16 %v369_v21, %v362_v20  ;;  %v361_v25 = vld [vmem:[#allocation2 + $0x80] sm:$0xff]  ;;  %v368_v26 = vld [vmem:[#allocation2 + $0xb8] sm:$0xff]  ;;  %988 = vmatpush1.bf16.msra.mxu0 %v987_v13  ;;  %v374_v27 = vld [vmem:[#allocation2 + $0xe8] sm:$0xff]  ;;  %1004 = vmatpush1.bf16.msra.mxu1 %v1003_v18  ;;  %v991_v29 = vpack.c.bf16 %v366_v24, %v359_v22  ;;  %s1049_s17 = smul.u32 224, %s231_s14 }
  0x3a   : > { %v241_v2 = vld [vmem:[%s1346_s9] sm:$0xff]  ;;  %v242_v5 = vld [vmem:[%s1346_s9 + $0x8] sm:$0xff]  ;;  %990 = vmatprep.subr.bf16.mxu0 %v989_v19  ;;  %v1007_v30 = vpack.c.bf16 %v368_v26, %v361_v25  ;;  %v376_v31 = vld [vmem:[#allocation2 + $0xf8] sm:$0xff]  ;;  %s1050_s25 = smul.u32 3584, %s1278_s22  ;;  %s1504_s22 = scalar_lea.sflag [#allocation4], %s231_s14 }
  0x3b   : > { %303 = vperm.xlu1 %1111, %v241_v2   ;;  %248 = vperm.xlu0 %1109, %v241_v2   ;;  %v381_v28 = vld [vmem:[#allocation2 + $0x120] sm:$0xff]  ;;  %v383_v32 = vld [vmem:[#allocation2 + $0x130] sm:$0xff]  ;;  %v380_v36 = vld [vmem:[#allocation2 + $0x118] sm:$0xff]  ;;  %s1456_s23 = scalar_lea.vmem [#allocation5], %s1049_s17  ;;  %p1561_p9 = scmp.ne.s32.totalorder %s1554_s28, 0 }
  0x3c   : > { %1006 = vmatprep.subr.bf16.mxu1 %v1005_v23  ;;  %v993_v33 = vpack.c.bf16 %v381_v28, %v374_v27  ;;  %v1009_v34 = vpack.c.bf16 %v383_v32, %v376_v31  ;;  %v373_v35 = vld [vmem:[#allocation2 + $0xe0] sm:$0xff]  ;;  %v375_v37 = vld [vmem:[#allocation2 + $0xf0] sm:$0xff]  ;;  %v382_v38 = vld [vmem:[#allocation2 + $0x128] sm:$0xff]  ;;  %s847_s26 = sshll.u32 %s1456_s23, 4  ;;  %s1496_s8 = scalar_lea.hbm %s1550_s5, %s1050_s25  ;;  %s1498_s26 = int_to_ptr.vmem [resolvable:$true] %s847_s26 }
  0x3d   : > { %v388_v39 = vld [vmem:[#allocation2 + $0x158] sm:$0xff]  ;;  %v395_v40 = vld [vmem:[#allocation2 + $0x190] sm:$0xff]  ;;  %v390_v41 = vld [vmem:[#allocation2 + $0x168] sm:$0xff]  ;;  %992 = vmatpush1.bf16.msra.mxu0 %v991_v29  ;;  %1008 = vmatpush1.bf16.msra.mxu1 %v1007_v30  ;;  %v995_v43 = vpack.c.bf16 %v380_v36, %v373_v35  ;;  %v1011_v45 = vpack.c.bf16 %v382_v38, %v375_v37  ;;  %s1149_s30 = scalar_lea.vmem %s1498_s26, 3584 }
  0x3e   : > { %v397_v42 = vld [vmem:[#allocation2 + $0x1a0] sm:$0xff]  ;;  %v243_v44 = vld [vmem:[%s1346_s9 + $0x10] sm:$0xff]  ;;  %994 = vmatprep.subr.bf16.mxu0 %v993_v33  ;;  %1010 = vmatprep.subr.bf16.mxu1 %v1009_v34  ;;  %v997_v46 = vpack.c.bf16 %v395_v40, %v388_v39  ;;  %v394_v49 = vld [vmem:[#allocation2 + $0x188] sm:$0xff]  ;;  %p1150_p6 = scmp.ne.s32.totalorder %s1498_s26, %s1149_s30 }
  0x3f   : > { %1112 = vset.pattern.permute.xlu1 %v1221_v1  ;;  %1110 = vset.pattern.permute.xlu0 %v1222_v17  ;;  %v1013_v47 = vpack.c.bf16 %v397_v42, %v390_v41  ;;  %v387_v48 = vld [vmem:[#allocation2 + $0x150] sm:$0xff]  ;;  %v389_v50 = vld [vmem:[#allocation2 + $0x160] sm:$0xff]  ;;  %v396_v51 = vld [vmem:[#allocation2 + $0x198] sm:$0xff] }
  0x40   : > { %253 = vperm.xlu1 %1112, %v242_v5   ;;  %275 = vperm.xlu0 %1110, %v241_v2   ;;  %v244_v52 = vld [vmem:[%s1346_s9 + $0x18] sm:$0xff]  ;;  %v999_v53 = vpack.c.bf16 %v394_v49, %v387_v48  ;;  %v1015_v54 = vpack.c.bf16 %v396_v51, %v389_v50  ;;  %v350_v56 = vld [vmem:[#allocation2 + $0x28] sm:$0xff]  ;;  %v357_v57 = vld [vmem:[#allocation2 + $0x60] sm:$0xff]  ;;  %v268_v2 = vsub.s32 0, %v1364_v63  ;;  %p1151_p10 = pnand %p1150_p6, %p1561_p9  ;;  %s1224_s9 = smov [#allocation5]  }
  0x41   : > { %996 = vmatpush1.bf16.msra.mxu0 %v995_v43  ;;  %1012 = vmatpush1.bf16.msra.mxu1 %v1011_v45  ;;  %v351_v58 = vld [vmem:[#allocation2 + $0x30] sm:$0xff]  ;;  %v1017_v59 = vpack.c.bf16 %v357_v57, %v350_v56  ;;  %v358_v60 = vld [vmem:[#allocation2 + $0x68] sm:$0xff]  ;;  %v1390_v15 = vld [vmem:[%s1547_s2] ss:$0 sm:$0xff]  ;;  %s1153_s10 = sshll.u32 %s1224_s9, 4  ;;  %s1154_s10 = int_to_ptr.vmem [resolvable:$false] %s1153_s10 }
  0x42   : > { %998 = vmatprep.subr.bf16.mxu0 %v997_v46  ;;  %1014 = vmatprep.subr.bf16.mxu1 %v1013_v47  ;;  %v1033_v61 = vpack.c.bf16 %v358_v60, %v351_v58  ;;  %v349_v22 = vld [vmem:[#allocation2 + $0x20] sm:$0xff]  ;;  %v356_v23 = vld [vmem:[#allocation2 + $0x58] sm:$0xff]  ;;  %v371_v26 = vld [vmem:[#allocation2 + $0xd0] sm:$0xff]  ;;  %p1152_p12 = pneg %p1151_p10  ;;  %s1155_s11 = scalar_lea.vmem %s1154_s10, 7168 }
  0x43   : > { %v364_v24 = vld [vmem:[#allocation2 + $0x98] sm:$0xff]  ;;  %v365_v27 = vld [vmem:[#allocation2 + $0xa0] sm:$0xff]  ;;  %v1019_v31 = vpack.c.bf16 %v356_v23, %v349_v22  ;;  %v363_v36 = vld [vmem:[#allocation2 + $0x90] sm:$0xff]  ;;  %p1156_p2 = scmp.lt.s32.totalorder %s1498_s26, %s1154_s10  ;;  %p1157_p3 = scmp.lt.s32.totalorder %s1155_s11, %s1149_s30 }
  0x44   : > { %1113 = vset.pattern.permute.xlu1 %v1222_v17  ;;  %1114 = vset.pattern.permute.xlu0 %v1220_v0  ;;  %v372_v28 = vld [vmem:[#allocation2 + $0xd8] sm:$0xff]  ;;  %v1021_v34 = vpack.c.bf16 %v371_v26, %v364_v24  ;;  %v370_v37 = vld [vmem:[#allocation2 + $0xc8] sm:$0xff]  ;;  %v385_v40 = vld [vmem:[#allocation2 + $0x140] sm:$0xff] }
  0x45   : > { %279 = vperm.xlu1 %1113, %v242_v5   ;;  %307 = vperm.xlu0 %1114, %v242_v5   ;;  %v1037_v35 = vpack.c.bf16 %v372_v28, %v365_v27  ;;  %v378_v38 = vld [vmem:[#allocation2 + $0x108] sm:$0xff]  ;;  %v379_v41 = vld [vmem:[#allocation2 + $0x110] sm:$0xff]  ;;  %v377_v48 = vld [vmem:[#allocation2 + $0x100] sm:$0xff]  ;;  %p1158_p4 = por %p1157_p3, %p1156_p2 }
  0x46   : > { %1000 = vmatpush1.bf16.msra.mxu0 %v999_v53  ;;  %1016 = vmatpush1.bf16.msra.mxu1 %v1015_v54  ;;  %v386_v42 = vld [vmem:[#allocation2 + $0x148] sm:$0xff]  ;;  %v1025_v47 = vpack.c.bf16 %v385_v40, %v378_v38  ;;  %v384_v49 = vld [vmem:[#allocation2 + $0x138] sm:$0xff]  ;;  %v399_v54 = vld [vmem:[#allocation2 + $0x1b0] sm:$0xff] }
  0x47   : > { %1018 = vmatprep.subr.bf16.mxu0 %v1017_v59  ;;  %1034 = vmatprep.subr.bf16.mxu1 %v1033_v61  ;;  %v1041_v50 = vpack.c.bf16 %v386_v42, %v379_v41  ;;  %v392_v51 = vld [vmem:[#allocation2 + $0x178] sm:$0xff]  ;;  %v393_v56 = vld [vmem:[#allocation2 + $0x180] sm:$0xff]  ;;  %v1027_v60 = vpack.c.bf16 %v384_v49, %v377_v48  ;;  %p1159_p7 = pnand %p1158_p4, %p1152_p12 }
  0x48   : > { %v400_v57 = vld [vmem:[#allocation2 + $0x1b8] sm:$0xff]  ;;  %v1029_v62 = vpack.c.bf16 %v399_v54, %v392_v51 }
  0x49   : > { %1115 = vset.pattern.permute.xlu1 %v1221_v1  ;;  %311 = vperm.xlu0 %1114, %v243_v44  }
  0x4a   : > { %258 = vperm.xlu1 %1115, %v243_v44  }
  0x4d   : > { %1118 = vset.pattern.permute.xlu0 %v1222_v17 }
  0x4e   : > { %1116 = vset.pattern.permute.xlu1 %v1222_v17  ;;  %287 = vperm.xlu0 %1118, %v244_v52  }
  0x4f   : > { %283 = vperm.xlu1 %1116, %v243_v44   ;;  %v1023_v44 = vpack.c.bf16 %v370_v37, %v363_v36 }
  0x52   : > { %1120 = vset.pattern.permute.xlu0 %v1220_v0 }
  0x53   : > { %1117 = vset.pattern.permute.xlu1 %v1221_v1  ;;  %v245_v1 = vld [vmem:[%s1546_s1] sm:$0x7] }
  0x54   : > { %263 = vperm.xlu1 %1117, %v244_v52   ;;  %v1374_v6 = vrot.slane %v245_v1, %v268_v2  ;;  %v1378_v7 = vrot.slane %v245_v1, %v292_v3  ;;  %v1382_v8 = vrot.slane %v245_v1, %v320_v4  ;;  %v1045_v1 = vpack.c.bf16 %v400_v57, %v393_v56 }
  0x58   : > { %1119 = vset.pattern.permute.xlu1 %v1220_v0 }
  0x59   : > { %315 = vperm.xlu1 %1119, %v244_v52  }
  0xba   : > { %v304_v5 = vpop.permute.xlu1 %303  ;;  %v249_v0 = vpop.permute.xlu0 %248 }
  0xbb   : > { %v270_v9 = vmul.f32 %v1374_v6, %v249_v0  ;;  %v322_v13 = vmul.f32 %v1382_v8, %v304_v5 }
  0xbf   : > { %v254_v10 = vpop.permute.xlu1 %253  ;;  %v276_v11 = vpop.permute.xlu0 %275 }
  0xc0   : > { %v294_v12 = vmul.f32 %v1378_v7, %v276_v11  ;;  %v271_v19 = vmul.f32 %v1374_v6, %v254_v10  ;;  %v398_v10 = vld [vmem:[#allocation2 + $0x1a8] sm:$0xff] }
  0xc2   : > { %v298_v14 = vadd.f32 %v294_v12, %v270_v9  ;;  %v391_v9 = vld [vmem:[#allocation2 + $0x170] sm:$0xff] }
  0xc4   : > { %v326_v16 = vadd.f32 %v322_v13, %v298_v14  ;;  %v280_v17 = vpop.permute.xlu1 %279  ;;  %v308_v18 = vpop.permute.xlu0 %307 }
  0xc5   : > { %v295_v20 = vmul.f32 %v1378_v7, %v280_v17  ;;  %v323_v21 = vmul.f32 %v1382_v8, %v308_v18 }
  0xc6   : > { %v337_v25 = vadd.f32 %v1390_v15, %v326_v16  ;;  %v1031_v16 = vpack.c.bf16 %v398_v10, %v391_v9 }
  0xc7   : > { %v299_v29 = vadd.f32 %v295_v20, %v271_v19 }
  0xc8   : > { %v1396_v30 = vmax.f32 %v337_v25, 0.0  ;;  %v312_v45 = vpop.permute.xlu0 %311 }
  0xc9   : > { %v327_v32 = vadd.f32 %v323_v21, %v299_v29  ;;  %v259_v33 = vpop.permute.xlu1 %258  ;;  %v324_v58 = vmul.f32 %v1382_v8, %v312_v45  ;;  %v421_v45 = vsub.s32 4, %v1364_v63 }
  0xca   : > { %930 = vmatmul.mubr.msk.f32.vlgmr.msra.gmra.mrb[0].mxu0 %vm438_vm0, %v1396_v30  ;;  %934 = vmatmul.mubr.msk.f32.vlgmr.msra.gmra.mrb[0].mxu1 %vm438_vm0, %v1396_v30  ;;  %v272_v52 = vmul.f32 %v1374_v6, %v259_v33 }
  0xcb   : > { %v338_v39 = vadd.f32 %v1390_v15, %v327_v32  ;;  %521 = vmatprep.mubr.f32.mxu0 %v1223_v55  ;;  %610 = vmatprep.mubr.f32.mxu1 %v1223_v55 }
  0xcc   : > { %1020 = vmatpush1.bf16.msra.mxu0 %v1019_v31  ;;  %1036 = vmatpush3.bf16.msra.mxu1 %v1033_v61 }
  0xcd   : > { %v1405_v43 = vmax.f32 %v338_v39, 0.0  ;;  %1022 = vmatprep.subr.bf16.mxu0 %v1021_v34  ;;  %1038 = vmatprep.subr.bf16.mxu1 %v1037_v35  ;;  %v288_v61 = vpop.permute.xlu0 %287 }
  0xce   : > { %v284_v46 = vpop.permute.xlu1 %283  ;;  %v297_v13 = vmul.f32 %v1378_v7, %v288_v61 }
  0xcf   : > { %v296_v53 = vmul.f32 %v1378_v7, %v284_v46  ;;  %931 = vmatmul.mubr.msk.f32.gmra.mrb[2].mxu0 %vm438_vm0, %v1405_v43  ;;  %935 = vmatmul.mubr.msk.f32.gmra.mrb[2].mxu1 %vm438_vm0, %v1405_v43  ;;  %v429_v46 = vsub.s32 6, %v1364_v63 }
  0xd0   : > { %527 = vmatprep.mubr.f32.mxu0 %v1223_v55  ;;  %616 = vmatprep.mubr.f32.mxu1 %v1223_v55 }
  0xd1   : > { %v300_v59 = vadd.f32 %v296_v53, %v272_v52  ;;  %1024 = vmatpush1.bf16.msra.mxu0 %v1023_v44  ;;  %1040 = vmatpush3.bf16.msra.mxu1 %v1037_v35 }
  0xd2   : > { %1026 = vmatprep.subr.bf16.mxu0 %v1025_v47  ;;  %1042 = vmatprep.subr.bf16.mxu1 %v1041_v50  ;;  %v425_v47 = vsub.s32 5, %v1364_v63 }
  0xd3   : > { %v328_v5 = vadd.f32 %v324_v58, %v300_v59  ;;  %v264_v0 = vpop.permute.xlu1 %263 }
  0xd4   : > { %v273_v12 = vmul.f32 %v1374_v6, %v264_v0 }
  0xd5   : > { %v339_v11 = vadd.f32 %v1390_v15, %v328_v5  ;;  %1028 = vmatpush1.bf16.msra.mxu0 %v1027_v60  ;;  %1044 = vmatpush3.bf16.msra.mxu1 %v1041_v50 }
  0xd6   : > { %1030 = vmatprep.subr.bf16.mxu0 %v1029_v62  ;;  %1046 = vmatprep.subr.bf16.mxu1 %v1045_v1  ;;  %v301_v18 = vadd.f32 %v297_v13, %v273_v12 }
  0xd7   : > { %v343_v14 = vmax.f32 %v339_v11, 0.0 }
  0xd8   : > { %v316_v17 = vpop.permute.xlu1 %315 }
  0xd9   : > { %v325_v19 = vmul.f32 %v1382_v8, %v316_v17  ;;  %932 = vmatmul.mubr.msk.f32.gmra.mrb[4].mxu0 %vm438_vm0, %v343_v14  ;;  %936 = vmatmul.mubr.msk.f32.gmra.mrb[4].mxu1 %vm438_vm0, %v343_v14  ;;  %v401_v8 = vld [vmem:[%s1549_s4] sm:$0x7f] }
  0xda   : > { %533 = vmatprep.mubr.f32.mxu0 %v1223_v55  ;;  %622 = vmatprep.mubr.f32.mxu1 %v1223_v55  ;;  %v406_v21 = vrot.slane %v401_v8, %v268_v2  ;;  %v414_v22 = vrot.slane %v401_v8, %v320_v4  ;;  %v422_v54 = vrot.slane %v401_v8, %v421_v45 }
  0xdb   : > { %v329_v6 = vadd.f32 %v325_v19, %v301_v18  ;;  %1032 = vmatpush1.bf16.msra.mxu0 %v1031_v16  ;;  %1048 = vmatpush3.bf16.msra.mxu1 %v1045_v1  ;;  %v430_v56 = vrot.slane %v401_v8, %v429_v46  ;;  %v426_v59 = vrot.slane %v401_v8, %v425_v47 }
  0xdd   : > { %v340_v7 = vadd.f32 %v1390_v15, %v329_v6  ;;  %v417_v15 = vsub.s32 3, %v1364_v63 }
  0xdf   : > { %v344_v20 = vmax.f32 %v340_v7, 0.0  ;;  %v418_v23 = vrot.slane %v401_v8, %v417_v15 }
  0xe1   : > { %933 = vmatmul.mubr.msk.f32.gmra.mrb[6].mxu0 %vm438_vm0, %v344_v20  ;;  %937 = vmatmul.mubr.msk.f32.gmra.mrb[6].mxu1 %vm438_vm0, %v344_v20 }
  0xe2   : > { %979 = vmatprep.mubr.msk.f32.mxu1 %vm438_vm0, %v1396_v30  ;;  %693 = vmatprep.mubr.f32.mxu0 %v1223_v55 }
  0xe5   : > { %938 = vmatmul.mubr.msk.f32.vlgmr.msra.gmra.mrb[8].mxu0 %vm438_vm0, %v1396_v30  ;;  %980 = vmatmul.mubr.msk.f32.vlgmr.msra.gmra.mrb[8].mxu1 %vm438_vm0, %v1405_v43 }
  0xe6   : > { %982 = vmatprep.mubr.msk.f32.mxu1 %vm438_vm0, %v343_v14  ;;  %699 = vmatprep.mubr.f32.mxu0 %v1223_v55 }
  0xe9   : > { %939 = vmatmul.mubr.msk.f32.gmra.mrb[10].mxu0 %vm438_vm0, %v1405_v43  ;;  %983 = vmatmul.mubr.msk.f32.gmra.mrb[10].mxu1 %vm438_vm0, %v344_v20 }
  0xea   : > { %705 = vmatprep.mubr.f32.mxu0 %v1223_v55 }
  0xed   : > { %940 = vmatmul.mubr.msk.f32.gmra.mrb[12].mxu0 %vm438_vm0, %v343_v14 }
  0xee   : > { %711 = vmatprep.mubr.f32.mxu0 %v1223_v55  ;;  %v410_v55 = vrot.slane %v401_v8, %v292_v3 }
  0xf1   : > { %941 = vmatmul.mubr.msk.f32.gmra.mrb[14].mxu0 %vm438_vm0, %v344_v20 }
 0x19d   : > { %v517_v24 = vpop.f32.mrb[0].mxu0  ;;  %v606_v25 = vpop.f32.mrb[0].mxu1 }
 0x19e   : > { %v518_v26 = vadd.f32 %v517_v24, %v406_v21  ;;  %v607_v27 = vadd.f32 %v606_v25, %v414_v22  ;;  %v519_v28 = vpop.f32.mrb[1].mxu0  ;;  %v608_v29 = vpop.f32.mrb[1].mxu1 }
 0x19f   : > { %v520_v30 = vadd.f32 %v519_v28, %v410_v55  ;;  %v609_v31 = vadd.f32 %v608_v29, %v418_v23 }
 0x1a0   : > { %803 = vst [vmem:[%s1456_s23] sm:$0xff] %v518_v26  ;;  %805 = vst [vmem:[%s1456_s23 + $0x10] sm:$0xff] %v607_v27 }
 0x1a1   : > { %804 = vst [vmem:[%s1456_s23 + $0x8] sm:$0xff] %v520_v30  ;;  %806 = vst [vmem:[%s1456_s23 + $0x18] sm:$0xff] %v609_v31 }
 0x1a2   : > { %v523_v2 = vpop.f32.mrb[2].mxu0  ;;  %v612_v3 = vpop.f32.mrb[2].mxu1 }
 0x1a3   : > { %v524_v4 = vadd.f32 %v523_v2, %v406_v21  ;;  %v613_v32 = vadd.f32 %v612_v3, %v414_v22  ;;  %v525_v33 = vpop.f32.mrb[3].mxu0  ;;  %v614_v34 = vpop.f32.mrb[3].mxu1 }
 0x1a4   : > { %v526_v35 = vadd.f32 %v525_v33, %v410_v55  ;;  %v615_v36 = vadd.f32 %v614_v34, %v418_v23 }
 0x1a5   : > { %811 = vst [vmem:[%s1456_s23 + $0x38] sm:$0xff] %v524_v4  ;;  %813 = vst [vmem:[%s1456_s23 + $0x48] sm:$0xff] %v613_v32 }
 0x1a6   : > { %812 = vst [vmem:[%s1456_s23 + $0x40] sm:$0xff] %v526_v35  ;;  %814 = vst [vmem:[%s1456_s23 + $0x50] sm:$0xff] %v615_v36 }
 0x1ac   : > { %v529_v37 = vpop.f32.mrb[4].mxu0  ;;  %v618_v38 = vpop.f32.mrb[4].mxu1 }
 0x1ad   : > { %v530_v39 = vadd.f32 %v529_v37, %v406_v21  ;;  %v619_v40 = vadd.f32 %v618_v38, %v414_v22  ;;  %v531_v41 = vpop.f32.mrb[5].mxu0  ;;  %v620_v42 = vpop.f32.mrb[5].mxu1 }
 0x1ae   : > { %v532_v43 = vadd.f32 %v531_v41, %v410_v55  ;;  %v621_v44 = vadd.f32 %v620_v42, %v418_v23 }
 0x1af   : > { %818 = vst [vmem:[%s1456_s23 + $0x70] sm:$0xff] %v530_v39  ;;  %820 = vst [vmem:[%s1456_s23 + $0x80] sm:$0xff] %v619_v40 }
 0x1b0   : > { %819 = vst [vmem:[%s1456_s23 + $0x78] sm:$0xff] %v532_v43  ;;  %821 = vst [vmem:[%s1456_s23 + $0x88] sm:$0xff] %v621_v44 }
 0x1b4   : > { %v535_v48 = vpop.f32.mrb[6].mxu0  ;;  %v624_v49 = vpop.f32.mrb[6].mxu1 }
 0x1b5   : > { %v536_v50 = vadd.f32 %v535_v48, %v406_v21  ;;  %v625_v51 = vadd.f32 %v624_v49, %v414_v22  ;;  %v537_v52 = vpop.f32.mrb[7].mxu0  ;;  %v626_v53 = vpop.f32.mrb[7].mxu1 }
 0x1b6   : > { %v538_v57 = vadd.f32 %v537_v52, %v410_v55  ;;  %v627_v58 = vadd.f32 %v626_v53, %v418_v23 }
 0x1b7   : > { %825 = vst [vmem:[%s1456_s23 + $0xa8] sm:$0xff] %v536_v50  ;;  %827 = vst [vmem:[%s1456_s23 + $0xb8] sm:$0xff] %v625_v51 }
 0x1b8   : > { %826 = vst [vmem:[%s1456_s23 + $0xb0] sm:$0xff] %v538_v57  ;;  %828 = vst [vmem:[%s1456_s23 + $0xc0] sm:$0xff] %v627_v58  ;;  %v695_v63 = vpop.f32.mrb[8].mxu0  ;;  %v981_v60 = vpop.f32.mrb[8].mxu1 }
 0x1b9   : > { %v696_v61 = vadd.f32 %v695_v63, %v422_v54  ;;  %v790_v62 = vadd.f32 %v981_v60, %v430_v56  ;;  %v697_v1 = vpop.f32.mrb[9].mxu0  ;;  %v784_v5 = vpop.f32.mrb[9].mxu1 }
 0x1ba   : > { %v698_v0 = vadd.f32 %v697_v1, %v426_v59  ;;  %v785_v9 = vadd.f32 %v784_v5, %v430_v56 }
 0x1bb   : > { %807 = vst [vmem:[%s1456_s23 + $0x20] sm:$0xff] %v696_v61  ;;  %817 = vst.msk [vmem:[%s1456_s23 + $0x68] sm:$0xff] %vm809_vm1, %v790_v62 }
 0x1bc   : > { %808 = vst [vmem:[%s1456_s23 + $0x28] sm:$0xff] %v698_v0  ;;  %810 = vst.msk [vmem:[%s1456_s23 + $0x30] sm:$0xff] %vm809_vm1, %v785_v9  ;;  %v701_v10 = vpop.f32.mrb[10].mxu0  ;;  %v984_v11 = vpop.f32.mrb[10].mxu1 }
 0x1bd   : > { %v702_v12 = vadd.f32 %v701_v10, %v422_v54  ;;  %v800_v13 = vadd.f32 %v984_v11, %v430_v56  ;;  %v703_v14 = vpop.f32.mrb[11].mxu0  ;;  %v794_v16 = vpop.f32.mrb[11].mxu1 }
 0x1be   : > { %v704_v17 = vadd.f32 %v703_v14, %v426_v59  ;;  %v795_v18 = vadd.f32 %v794_v16, %v430_v56 }
 0x1bf   : > { %815 = vst [vmem:[%s1456_s23 + $0x58] sm:$0xff] %v702_v12  ;;  %831 = vst.msk [vmem:[%s1456_s23 + $0xd8] sm:$0xff] %vm809_vm1, %v800_v13 }
 0x1c0   : > { %816 = vst [vmem:[%s1456_s23 + $0x60] sm:$0xff] %v704_v17  ;;  %824 = vst.msk [vmem:[%s1456_s23 + $0xa0] sm:$0xff] %vm809_vm1, %v795_v18  ;;  %v707_v19 = vpop.f32.mrb[12].mxu0 }
 0x1c1   : > { %v708_v6 = vadd.f32 %v707_v19, %v422_v54  ;;  %v709_v7 = vpop.f32.mrb[13].mxu0 }
 0x1c2   : > { %v710_v20 = vadd.f32 %v709_v7, %v426_v59 }
 0x1c3   : > { %822 = vst [vmem:[%s1456_s23 + $0x90] sm:$0xff] %v708_v6 }
 0x1c4   : > { %823 = vst [vmem:[%s1456_s23 + $0x98] sm:$0xff] %v710_v20  ;;  %v713_v8 = vpop.f32.mrb[14].mxu0 }
 0x1c5   : > { %v714_v15 = vadd.f32 %v713_v8, %v422_v54  ;;  %v715_v21 = vpop.f32.mrb[15].mxu0 }
 0x1c6   : > { %v716_v22 = vadd.f32 %v715_v21, %v426_v59 }
 0x1c7   : > { %829 = vst [vmem:[%s1456_s23 + $0xc8] sm:$0xff] %v714_v15 }
 0x1c8   : > { %830 = vst [vmem:[%s1456_s23 + $0xd0] sm:$0xff] %v716_v22 }
 0x1c9   : > { %1162 = shalt.err (!%p1159_p7)
}
 0x1ca   : > { %s1163_s12 = scalar_lea.hbm %s1496_s8, 3584  ;;  %s1167_s15 = scalar_lea.hbm %s1550_s5, 7168 }
 0x1cb   : > { %p1164_p8 = scmp.ne.s32.totalorder %s1496_s8, %s1163_s12  ;;  %p1168_p1 = scmp.lt.u32.totalorder %s1496_s8, %s1550_s5 }
 0x1cc   : > { %p1169_p0 = scmp.lt.u32.totalorder %s1167_s15, %s1163_s12  ;;  %p1171_p6 = scmp.lt.u32.totalorder %s1163_s12, %s1496_s8 }
 0x1cd   : > { %p1165_p11 = pnand %p1164_p8, %p1561_p9 }
 0x1ce   : > { %p1170_p5 = por %p1169_p0, %p1168_p1 }
 0x1cf   : > { %p1166_p13 = pneg %p1165_p11 }
 0x1d0   : > { %p1172_p10 = por %p1171_p6, %p1170_p5 }
 0x1d2   : > { %p1173_p12 = pnand %p1172_p10, %p1166_p13 }
 0x1d4   : > { %1176 = shalt.err (!%p1173_p12)
}
 0x1d5   : > { %s1225_s23 = smov 896   ;;  %s1226_s25 = smov 56  }
 0x1d6   : > { %1055 = dma.vmem_to_hbm [thread:$0]  (%p1561_p9), %s1498_s26, 3584, %s1496_s8, %s1504_s22, %s1225_s23, %s1225_s23, %s1226_s25  }
 0x1d7 PF: > { %p1067_p2 = scmp.ge.s32.totalorder %s1215_s21, 2  ;;  %s862_s6 = sand.u32 1, %s1203_s18  }
 0x1d8   : > { %p1562_p3 = scmp.ne.s32.totalorder %s1555_s29, 0  ;;  %s863_s7 = scalar_lea.sflag [#allocation4], %s862_s6 }
 0x1da   : > { %p1062_p4 = pnand %p1067_p2, %p1562_p3 }
 0x1dc   : > { %1198 = dma.done.wait (!%p1062_p4), %s863_s7, 3584  }
 0x1dd   : > { %1200 = vsyncadd (!%p1062_p4), %s863_s7, 4294963712  ;;  %p16_p7 = scmp.ge.s32.totalorder %s1282_s24, 4   ;;  %s1563_s18 = smov %s1207_s19 }
 0x1de   : > { %s1564_s19 = smov %s1211_s20  ;;  %s1565_s20 = smov %s1293_s27 }
 0x1df   : > { %s1566_s21 = smov %s1282_s24  ;;  %18 = sbr.rel (!%p16_p7) target bundleno = 4 (0x4), region = 80 }
 0x1e6   :  { %868 = vsyncpa [#allocation3], 1 }
 0x1e7   :  { %870 = vsyncpa [#allocation3 + $0x1], 1 }
 0x1e8   :  { %871 = vsyncpa [#allocation4], 1 }
 0x1e9   :  { %873 = vsyncpa [#allocation4 + $0x1], 1 }

</bundles_post_ra>
